<compile_context>
chip_gen: v6e
topology: v6e:2x2x1
jax: 0.10.0
libtpu: 0.0.40
codegen_flags: <defaults>
</compile_context>

<pallas_src>
import functools

import jax
import jax.numpy as jnp
from jax.experimental import pallas as pl
from jax.experimental.pallas import tpu as pltpu


_LANES = 512  # lane-dense last dim (multiple of 128 -> unmasked vst)


def _cdiv(a, b):
    return -(-a // b)


def _round_up(a, b):
    return _cdiv(a, b) * b


def _tile_bytes_and_min_blocks():
    """Per-generation tile size (bytes per buffer) and minimum grid blocks.

    Sizes are chosen so that 2 streams x 2 double-buffers stay inside each
    generation's scoped-VMEM default (16 MiB v5e, 32 MiB v6e/v7x) with headroom.
    """
    try:
        kind = jax.devices()[0].device_kind.lower()
    except Exception:  # pragma: no cover - defensive
        kind = ""
    if "v5" in kind:                   # v5e / v5p: 2 MiB is already ~93% of roofline
        return 2 * 1024 * 1024, 1
    if "v6" in kind:                   # v6e: 4 MiB x 4 buffers = 16 MiB live VMEM
        return 4 * 1024 * 1024, 1
    if "v7" in kind or "7x" in kind:   # v7x: 6 MiB x 4 = 24 MiB; 2 TCs -> >=2 blocks
        return 6 * 1024 * 1024, 2
    return 2 * 1024 * 1024, 1          # unknown: conservative, safe everywhere


_TILE_BYTES, _MIN_BLOCKS = _tile_bytes_and_min_blocks()


def _fake_quant_kernel(scale_ref, zp_ref, x_ref, o_ref, *, qmin, qmax):
    # scale_ref / zp_ref: (1,) per-tensor qparams in SMEM (scalar path).
    s = scale_ref[0]
    zp = zp_ref[0]
    inv_s = 1.0 / s                      # scalar reciprocal, off the vector path
    lo = qmin - zp                       # zero_point folded into clamp bounds
    hi = qmax - zp                       # (exact when zp is integer-valued)
    x = x_ref[...].astype(jnp.float32)   # upcast in-register (bf16 tiles DMA'd as bf16)
    q = jnp.clip(jnp.round(x * inv_s), lo, hi)       # quantize + clamp (zp-shifted range)
    o_ref[...] = (q * s).astype(o_ref.dtype)         # dequantize, store in input dtype


def fake_quant(x, scale, zero_point, *, bit=8, symmetric=False,
               max_tile_rows=None, donate=False):
    """Per-tensor fake quantization implemented as a Pallas TPU kernel.

    NOTE: zero_point is assumed integer-valued (standard affine quantization);
    a fractional zero_point would differ slightly from round(x/s + zp) - zp.
    """
    if symmetric:
        # TODO(synk): some sparsebit backends use -(2^(bit-1)-1); verify per config.
        qmin = float(-(2 ** (bit - 1)))
        qmax = float(2 ** (bit - 1) - 1)
    else:
        qmin = 0.0
        qmax = float(2 ** bit - 1)

    orig_shape = x.shape
    dtype = x.dtype
    itemsize = jnp.dtype(dtype).itemsize
    # min sublane granule for a non-full-dim block: 8 for 4-byte, 16 for 2-byte dtypes
    granule = max(8, 32 // itemsize)
    lanes = _LANES
    total = int(x.size)

    scale = jnp.asarray(scale, jnp.float32).reshape(-1)[:1]
    zero_point = jnp.asarray(zero_point, jnp.float32).reshape(-1)[:1]

    def _jnp_fallback(v):
        # Same folded formulation as the kernel (bit-identical for f32).
        s = scale[0]
        zp = zero_point[0]
        q = jnp.clip(jnp.round(v.astype(jnp.float32) * (1.0 / s)), qmin - zp, qmax - zp)
        return (q * s).astype(v.dtype)

    rows = total // lanes
    rem = total - rows * lanes

    if rows == 0:
        # Tiny tensor (< 512 elements): plain jnp is cheaper than a kernel launch.
        return _jnp_fallback(x)

    flat = x.reshape(-1)
    main = flat[: rows * lanes].reshape(rows, lanes)

    # Tile sizing: biggest granule-aligned row count that fits the per-gen budget.
    target_rows = max(granule, (_TILE_BYTES // (itemsize * lanes) // granule) * granule)
    if max_tile_rows is not None:
        target_rows = max(granule, min(target_rows, (max_tile_rows // granule) * granule))

    if rows <= target_rows:
        if _MIN_BLOCKS > 1 and rows >= 2 * granule:
            # Force >=2 blocks so both TensorCores stream (v7x megacore).
            tile_rows = min(rows, _round_up(_cdiv(rows, _MIN_BLOCKS), granule))
        else:
            tile_rows = rows          # single block covering the full row dim
    else:
        tile_rows = target_rows       # granule-aligned; last block may be partial
    n_blocks = _cdiv(rows, tile_rows)

    kernel = functools.partial(_fake_quant_kernel, qmin=qmin, qmax=qmax)
    cost = pl.CostEstimate(
        flops=6 * rows * lanes,                       # mul, round, max, min, mul, cast
        transcendentals=0,
        bytes_accessed=2 * rows * lanes * itemsize,   # one read + one write, streaming
    )

    out_main = pl.pallas_call(
        kernel,
        out_shape=jax.ShapeDtypeStruct((rows, lanes), dtype),
        grid=(n_blocks,),
        in_specs=[
            pl.BlockSpec(memory_space=pltpu.MemorySpace.SMEM),     # scale (per-tensor)
            pl.BlockSpec(memory_space=pltpu.MemorySpace.SMEM),     # zero_point
            pl.BlockSpec((tile_rows, lanes), lambda i: (i, 0)),    # x tile
        ],
        out_specs=pl.BlockSpec((tile_rows, lanes), lambda i: (i, 0)),
        compiler_params=pltpu.CompilerParams(dimension_semantics=("parallel",)),
        cost_estimate=cost,
        input_output_aliases=({2: 0} if donate else {}),
    )(scale, zero_point, main).reshape(-1)

    if rem:
        # Tail (< 512 elements) handled with plain jnp: avoids a full-array pad copy.
        tail_out = _jnp_fallback(flat[rows * lanes:])
        out_flat = jnp.concatenate([out_main, tail_out])
    else:
        out_flat = out_main
    return out_flat.reshape(orig_shape)


class Quantizer:
    """JAX/Pallas mirror of sparsebit Quantizer's forward-path state machine."""

    def __init__(self, bit=8, symmetric=False):
        # deterministic buffer init, identical to the torch register_buffer calls
        self.scale = jnp.array([1.0], dtype=jnp.float32)
        self.zero_point = jnp.array([0.0], dtype=jnp.float32)
        self.bit = bit
        self.symmetric = symmetric
        self.use_quant = False
        self.fake_fused = False
        # TODO(synk): observer.calc_qparams / update_observer (min-max calibration) and
        # per-channel (ch_axis) qparams are host-side/calibration logic, not the hot path.

    @property
    def is_enable(self):
        return self.use_quant and (not self.fake_fused)

    def enable_quant(self):
        self.use_quant = True

    def disable_quant(self):
        self.use_quant = False

    def set_fake_fused(self):
        self.fake_fused = True
        self.scale = jnp.array([1.0], dtype=jnp.float32)
        self.zero_point = jnp.array([0.0], dtype=jnp.float32)

    def forward(self, x):
        if self.is_enable:
            return fake_quant(
                x, self.scale, self.zero_point,
                bit=self.bit, symmetric=self.symmetric,
            )
        return x

    __call__ = forward


if __name__ == "__main__":
    key = jax.random.PRNGKey(0)
    x = jax.random.normal(key, (2, 4, 16, 16), dtype=jnp.float32)  # NCHW

    q = Quantizer(bit=8, symmetric=False)

    # disabled path: identity
    y_disabled = q(x)
    assert jnp.array_equal(y_disabled, x)

    # enabled path: fake quant-dequant with per-tensor qparams
    q.scale = jnp.array([0.05], dtype=jnp.float32)
    q.zero_point = jnp.array([128.0], dtype=jnp.float32)
    q.enable_quant()
    y = jax.block_until_ready(q(x))

    def ref_fake_quant(xx, s, zp, qmin, qmax):
        inv_s = (1.0 / s).astype(jnp.float32)
        qv = jnp.clip(jnp.round(xx.astype(jnp.float32) * inv_s), qmin - zp, qmax - zp)
        return (qv * s).astype(xx.dtype)

    ref = ref_fake_quant(x, q.scale[0], q.zero_point[0], 0.0, 255.0)
    assert y.shape == x.shape and y.dtype == x.dtype
    assert jnp.max(jnp.abs(y - ref)) < 1e-5

    # native bf16 I/O path (bf16 DMA, f32 compute in-register, bf16 store)
    xb = x.astype(jnp.bfloat16)
    yb = jax.block_until_ready(q(xb))
    refb = ref_fake_quant(xb, q.scale[0], q.zero_point[0], 0.0, 255.0)
    assert yb.shape == xb.shape and yb.dtype == jnp.bfloat16
    assert jnp.max(jnp.abs(yb.astype(jnp.float32) - refb.astype(jnp.float32))) < 2e-2

    # multi-block path with a partial trailing block (grid > 1, cdiv rows)
    x2 = jax.random.normal(jax.random.PRNGKey(1), (2, 4, 64, 64), dtype=jnp.float32)
    y2 = jax.block_until_ready(
        fake_quant(x2, q.scale, q.zero_point, bit=8, symmetric=False, max_tile_rows=24)
    )
    ref2 = ref_fake_quant(x2, q.scale[0], q.zero_point[0], 0.0, 255.0)
    assert y2.shape == x2.shape
    assert jnp.max(jnp.abs(y2 - ref2)) < 1e-5

    # non-lane-multiple size: kernel on the aligned prefix, jnp tail (no pad copies)
    x3 = jax.random.normal(jax.random.PRNGKey(2), (3, 5, 7, 11), dtype=jnp.float32)
    y3 = jax.block_until_ready(
        fake_quant(x3, q.scale, q.zero_point, bit=8, symmetric=False)
    )
    ref3 = ref_fake_quant(x3, q.scale[0], q.zero_point[0], 0.0, 255.0)
    assert y3.shape == x3.shape
    assert jnp.max(jnp.abs(y3 - ref3)) < 1e-5

    # donated (in-place quantize) path via input_output_aliases
    x4 = jax.random.normal(jax.random.PRNGKey(3), (2, 4, 16, 16), dtype=jnp.float32)
    ref4 = ref_fake_quant(x4, q.scale[0], q.zero_point[0], 0.0, 255.0)
    y4 = jax.block_until_ready(
        fake_quant(x4, q.scale, q.zero_point, bit=8, symmetric=False, donate=True)
    )
    assert jnp.max(jnp.abs(y4 - ref4)) < 1e-5

    print("KERNEL_OK")
</pallas_src>

<mosaic_0001>
module attributes {stable_mosaic.version = 11 : i64} {
  func.func @_fake_quant_kernel(%arg0: i32, %arg1: memref<1xf32, #tpu.memory_space<smem>>, %arg2: memref<1xf32, #tpu.memory_space<smem>>, %arg3: memref<4x512xf32, #tpu.memory_space<vmem>>, %arg4: memref<4x512xf32, #tpu.memory_space<vmem>>) attributes {dimension_semantics = [#tpu.dimension_semantics<parallel>], iteration_bounds = array<i64: 1>, scalar_prefetch = 0 : i64, scratch_operands = 0 : i64, tpu.core_type = #tpu.core_type<tc>, window_params = [{transform_indices = @transform_0, window_bounds = array<i64: 1>}, {transform_indices = @transform_1, window_bounds = array<i64: 1>}, {transform_indices = @transform_2, window_bounds = array<i64: 4, 512>}, {transform_indices = @transform_3, window_bounds = array<i64: 4, 512>}]} {
    %c0 = arith.constant 0 : index
    %0 = memref.load %arg1[%c0] : memref<1xf32, #tpu.memory_space<smem>>
    %c0_0 = arith.constant 0 : index
    %1 = memref.load %arg2[%c0_0] : memref<1xf32, #tpu.memory_space<smem>>
    %cst = arith.constant 1.000000e+00 : f32
    %2 = arith.divf %cst, %0 : f32
    %cst_1 = arith.constant 0.000000e+00 : f32
    %3 = arith.subf %cst_1, %1 : f32
    %cst_2 = arith.constant 2.550000e+02 : f32
    %4 = arith.subf %cst_2, %1 : f32
    %c0_3 = arith.constant 0 : index
    %c0_4 = arith.constant 0 : index
    %5 = vector.load %arg3[%c0_3, %c0_4] : memref<4x512xf32, #tpu.memory_space<vmem>>, vector<4x512xf32>
    %6 = vector.broadcast %2 : f32 to vector<4x512xf32>
    %7 = arith.mulf %5, %6 : vector<4x512xf32>
    %8 = math.roundeven %7 : vector<4x512xf32>
    %9 = vector.broadcast %3 : f32 to vector<4x512xf32>
    %10 = arith.maximumf %9, %8 : vector<4x512xf32>
    %11 = vector.broadcast %4 : f32 to vector<4x512xf32>
    %12 = arith.minimumf %11, %10 : vector<4x512xf32>
    %13 = vector.broadcast %0 : f32 to vector<4x512xf32>
    %14 = arith.mulf %12, %13 : vector<4x512xf32>
    %c0_5 = arith.constant 0 : index
    %c0_6 = arith.constant 0 : index
    %15 = vector.load %arg4[%c0_5, %c0_6] : memref<4x512xf32, #tpu.memory_space<vmem>>, vector<4x512xf32>
    tpu.vector_store %arg4[%c0_5, %c0_6], %14 {strides = array<i32>} : memref<4x512xf32, #tpu.memory_space<vmem>>, vector<4x512xf32>,
    return
  }
  func.func @transform_0(%arg0: i32) -> i32 {
    %c0_i32 = arith.constant 0 : i32
    %c0_i32_0 = arith.constant 0 : i32
    return %c0_i32 : i32
  }
  func.func @transform_1(%arg0: i32) -> i32 {
    %c0_i32 = arith.constant 0 : i32
    %c0_i32_0 = arith.constant 0 : i32
    return %c0_i32 : i32
  }
  func.func @transform_2(%arg0: i32) -> (i32, i32) {
    %c0_i32 = arith.constant 0 : i32
    %c0_i32_0 = arith.constant 0 : i32
    return %arg0, %c0_i32 : i32, i32
  }
  func.func @transform_3(%arg0: i32) -> (i32, i32) {
    %c0_i32 = arith.constant 0 : i32
    %c0_i32_0 = arith.constant 0 : i32
    return %arg0, %c0_i32 : i32, i32
  }
}

</mosaic_0001>

<bundles_post_ra>
// kernel: tpu_custom_call.1
= control target key start
LH: loop header
LB: loop body
LE: loop exit
PB: predicated region body
PF: predicated region fallthrough
CT: control target
= control target key end

     0   :  { %10 = vsyncpa [#allocation5], 0  ;;  %s172_s0 = inlined_call_operand.<no memory space> [shape: f32[1], index: 0, kind: input, shape index: {}]   ;;  %s173_s1 = inlined_call_operand.<no memory space> [shape: f32[1], index: 1, kind: input, shape index: {}]   ;;  %s174_s2 = inlined_call_operand.hbm [shape: f32[4,512], index: 2, kind: input, shape index: {}]   ;;  %s175_s3 = inlined_call_operand.hbm [shape: f32[4,512], index: 3, kind: output, shape index: {}]  }
   0x1   :  { %11 = vsyncpa [#allocation6], 0  ;;  %s135_s12 = smov [#allocation4]  }
   0x2   :  { %s22_s13 = sshll.u32 %s135_s12, 4  ;;  %s23_s13 = int_to_ptr.vmem [resolvable:$true] %s22_s13 }
   0x3   :  { %s99_s14 = scalar_lea.vmem %s23_s13, 256  ;;  %p104_p1 = scmp.lt.s32.totalorder %s23_s13, %s23_s13 }
   0x4   :  { %p100_p0 = scmp.ne.s32.totalorder %s23_s13, %s99_s14  ;;  %p105_p2 = scmp.lt.s32.totalorder %s99_s14, %s99_s14 }
   0x6   :  { %p106_p3 = por %p105_p2, %p104_p1 }
   0x8   :  { %p107_p4 = pnand %p106_p3, %p100_p0 }
   0xa   :  { %110 = shalt.err (!%p107_p4)
}
   0xb   :  { %25 = dma.hbm_to_vmem [thread:$0]  %s174_s2, 256, %s23_s13, [#allocation5]   ;;  %v31_v0 = vstv %s172_s0 }
   0xc   :  { %131 = dma.done.wait [#allocation5], 256  }
   0xd   :  { %132 = vsyncadd [#allocation5], 4294967040  ;;  %89 = vrcp.f32 %v31_v0  ;;  %v36_v2 = vld [vmem:[#allocation4] sm:$0xff]  ;;  %v37_v3 = vld [vmem:[#allocation4 + $0x8] sm:$0xff]  ;;  %s34_s21 = ssub.f32 0.0, %s173_s1  ;;  %s136_s24 = smov [#allocation7]  }
   0xe   :  { %s35_s23 = ssub.f32 255.0, %s173_s1  ;;  %s60_s25 = sshll.u32 %s136_s24, 4  ;;  %s61_s25 = int_to_ptr.vmem [resolvable:$true] %s60_s25 }
   0xf   :  { %v43_v18 = vstv %s34_s21  ;;  %s111_s1 = scalar_lea.vmem %s61_s25, 256  ;;  %p116_p6 = scmp.lt.s32.totalorder %s61_s25, %s61_s25 }
  0x10   :  { %v46_v21 = vstv %s35_s23  ;;  %p112_p5 = scmp.ne.s32.totalorder %s61_s25, %s111_s1  ;;  %p117_p7 = scmp.lt.s32.totalorder %s111_s1, %s111_s1 }
  0x12   :  { %p118_p8 = por %p117_p7, %p116_p6 }
  0x14   :  { %p119_p9 = pnand %p118_p8, %p112_p5 }
  0x1a   :  { %v90_v1 = vpop.eup %89 }
  0x1b   :  { %69 = vpush %v90_v1 }
  0x4c   :  { %s70_s19 = spop %69 }
  0x4d   :  { %v38_v4 = vstv %s70_s19 }
  0x4e   :  { %v39_v5 = vmul.f32 %v38_v4, %v36_v2  ;;  %v40_v6 = vmul.f32 %v38_v4, %v37_v3 }
  0x50   :  { %v73_v7 = vcvt.f32.s32 %v39_v5  ;;  %v81_v8 = vcvt.f32.s32 %v40_v6  ;;  %v71_v10 = vand.u32 2147483647, %v39_v5  ;;  %v76_v13 = vand.u32 2147483648, %v39_v5 }
  0x51   :  { %v79_v14 = vand.u32 2147483647, %v40_v6  ;;  %v84_v16 = vand.u32 2147483648, %v40_v6 }
  0x52   :  { %v74_v9 = vcvt.s32.f32 %v73_v7  ;;  %v82_v11 = vcvt.s32.f32 %v81_v8  ;;  %vm72_vm0 = vcmp.lt.f32.partialorder %v71_v10, 8388608.0 }
  0x53   :  { %vm80_vm1 = vcmp.lt.f32.partialorder %v79_v14, 8388608.0 }
  0x54   :  { %v75_v12 = vand.u32 2147483647, %v74_v9  ;;  %v83_v15 = vand.u32 2147483647, %v82_v11 }
  0x56   :  { %v77_v17 = vor.u32 %v76_v13, %v75_v12  ;;  %v85_v19 = vor.u32 %v84_v16, %v83_v15 }
  0x58   :  { %v78_v20 = vsel %vm72_vm0, %v77_v17, %v39_v5  ;;  %v86_v22 = vsel %vm80_vm1, %v85_v19, %v40_v6 }
  0x59   :  { %v44_v23 = vmax.f32 %v43_v18, %v78_v20  ;;  %v45_v24 = vmax.f32 %v43_v18, %v86_v22 }
  0x5b   :  { %v47_v25 = vmin.f32 %v46_v21, %v44_v23  ;;  %v48_v26 = vmin.f32 %v46_v21, %v45_v24 }
  0x5d   :  { %v50_v27 = vmul.f32 %v47_v25, %v31_v0  ;;  %v51_v28 = vmul.f32 %v48_v26, %v31_v0 }
  0x5f   :  { %52 = vst [vmem:[#allocation7] sm:$0xff] %v50_v27  ;;  %53 = vst [vmem:[#allocation7 + $0x8] sm:$0xff] %v51_v28 }
  0x60   :  { %122 = shalt.err (!%p119_p9)
}
  0x61   :  { %63 = dma.vmem_to_hbm [thread:$0]  %s61_s25, 256, %s175_s3, [#allocation6]  }
  0x62   :  { %133 = dma.done.wait [#allocation6], 256  }
  0x63   :  { %134 = vsyncadd [#allocation6], 4294967040 }
  0x64   :  { %67 = vsyncpa [#allocation5], 1 }
  0x65   :  { %68 = vsyncpa [#allocation6], 1 }

</bundles_post_ra>
